<compile_context>
chip_gen: v7x
topology: tpu7x:2x2x1
jax: 0.10.0
libtpu: 0.0.40
codegen_flags: <defaults>
</compile_context>

<pallas_src>
import jax
import jax.numpy as jnp
from jax.experimental import pallas as pl
from jax.experimental.pallas import tpu as pltpu


# ----------------------------------------------------------------------------
# Kernels
# ----------------------------------------------------------------------------
def _make_fused_kernel(hw_true):
    """Fused SRM for one (sample, channel-block) tile; full HW resident."""
    inv_n = 1.0 / float(hw_true)
    # HW == 1 -> unbiased std is NaN, matching torch.std(ddof=1) semantics.
    inv_nm1 = (1.0 / float(hw_true - 1)) if hw_true > 1 else float("nan")

    def kernel(x_ref, p_ref, o_ref):
        # x_ref: (1, Cb, HWp) native dtype; p_ref: (Cb, 4) f32; o_ref like x_ref.
        x = x_ref[0]                                    # (Cb, HWp)
        xf = x.astype(jnp.float32)
        # Single streaming pass: sum and sum-of-squares together.
        s1 = jnp.sum(xf, axis=1, keepdims=True)         # (Cb, 1)
        s2 = jnp.sum(xf * xf, axis=1, keepdims=True)    # (Cb, 1)
        mean = s1 * inv_n
        var = jnp.maximum((s2 - s1 * mean) * inv_nm1, 0.0)
        std = jnp.sqrt(var)
        p = p_ref[...]                                  # [cfc_mean, cfc_std, scale, shift]
        z = mean * p[:, 0:1] + std * p[:, 1:2]
        z_hat = z * p[:, 2:3] + p[:, 3:4]
        g = 1.0 / (1.0 + jnp.exp(-z_hat))               # (Cb, 1) f32
        # Rescale in the native dtype (cast the gate down, not x up).
        o_ref[0] = x * g.astype(o_ref.dtype)

    return kernel


def _make_stats_kernel(hw_true):
    """HW-tiled stats/gate kernel: reduce over the HW grid axis (last, arbitrary)."""
    inv_n = 1.0 / float(hw_true)
    inv_nm1 = (1.0 / float(hw_true - 1)) if hw_true > 1 else float("nan")

    def kernel(x_ref, p_ref, g_ref, s1_ref, s2_ref):
        k = pl.program_id(2)

        @pl.when(k == 0)
        def _():
            s1_ref[...] = jnp.zeros_like(s1_ref)
            s2_ref[...] = jnp.zeros_like(s2_ref)

        xf = x_ref[0].astype(jnp.float32)               # (Cb, HWb)
        s1_ref[...] += jnp.sum(xf, axis=1, keepdims=True)
        s2_ref[...] += jnp.sum(xf * xf, axis=1, keepdims=True)

        @pl.when(k == pl.num_programs(2) - 1)
        def _():
            s1 = s1_ref[...]
            s2 = s2_ref[...]
            mean = s1 * inv_n
            var = jnp.maximum((s2 - s1 * mean) * inv_nm1, 0.0)
            std = jnp.sqrt(var)
            p = p_ref[...]
            z = mean * p[:, 0:1] + std * p[:, 1:2]
            z_hat = z * p[:, 2:3] + p[:, 3:4]
            g_ref[0] = 1.0 / (1.0 + jnp.exp(-z_hat))    # (Cb, 1) f32

    return kernel


def _apply_kernel(x_ref, g_ref, o_ref):
    """Elementwise gate application for the HW-tiled fallback path."""
    o_ref[0] = x_ref[0] * g_ref[0].astype(o_ref.dtype)


# ----------------------------------------------------------------------------
# Tiling helpers
# ----------------------------------------------------------------------------
def _round_up(n, m):
    return ((n + m - 1) // m) * m


def _vmem_budget_and_limit():
    """Per-tile VMEM budget + scoped vmem_limit_bytes, by TPU generation."""
    try:
        info = pltpu.get_tpu_info()
        cap = getattr(info, "vmem_capacity_bytes", None) or (64 << 20)
    except Exception:  # pragma: no cover - e.g. interpret mode
        cap = 64 << 20
    if cap >= (100 << 20):          # v5e / v6e: 128 MiB physical VMEM
        return 28 << 20, 64 << 20
    else:                           # v7x: 64 MiB physical, be conservative
        return 12 << 20, 40 << 20


def _choose_c_block(C, align, bytes_per_chan, budget, n_batch, step_target=8):
    """Largest aligned divisor of C (or C) whose tile fits the budget, shrunk
    (while tiles stay >= ~1 MiB) to reach `step_target` grid steps for megacore.
    Returns None when even the smallest aligned block exceeds the budget."""
    cands = sorted({C} | {d for d in range(align, C, align) if C % d == 0},
                   reverse=True)
    fitting = [d for d in cands if d * bytes_per_chan <= budget]
    if not fitting:
        return None
    for d in fitting:                               # descending: largest first
        if n_batch * (C // d) >= step_target:
            return d
    # Step target unreachable: maximize steps while keeping tiles >= ~1 MiB.
    best = fitting[0]
    for d in fitting:
        if d * bytes_per_chan < (1 << 20):
            break
        best = d
    return best


def _largest_divisor(n, align, limit):
    """Largest d | n with d % align == 0 and d <= limit, or None."""
    best = None
    d = align
    top = min(n, limit)
    while d <= top:
        if n % d == 0:
            best = d
        d += align
    return best


# ----------------------------------------------------------------------------
# Wrapper
# ----------------------------------------------------------------------------
def srm_layer(x_nchw, cfc, bn_gamma, bn_beta, bn_mean, bn_var, eps=1e-5,
              *, donate_input=False, max_tile_bytes=None):
    """Forward pass of SRMLayer (eval-mode BN). x_nchw: (N, C, H, W)."""
    N, C, H, W = x_nchw.shape
    HW = H * W
    dtype = x_nchw.dtype
    itemsize = jnp.dtype(dtype).itemsize
    # Native sublane alignment: 8 for f32, 16 for bf16, 32 for int8/fp8.
    align = max(8, 32 // itemsize)

    budget, vmem_cap = _vmem_budget_and_limit()
    if max_tile_bytes is not None:
        budget = int(max_tile_bytes)

    # Fold eval-mode BatchNorm into a per-channel affine; pack all params.
    scale = (bn_gamma / jnp.sqrt(bn_var + eps)).astype(jnp.float32)
    shift = (bn_beta - bn_mean * scale).astype(jnp.float32)
    params = jnp.stack(
        [cfc[:, 0].astype(jnp.float32), cfc[:, 1].astype(jnp.float32), scale, shift],
        axis=1)                                                     # (C, 4)

    # Free reshape (contiguous NCHW) -> lane dim is H*W inside the kernel.
    x3 = x_nchw.reshape(N, C, HW)

    # Lane density: pad the spatial dim to 128 when it is small (zero padding
    # is exact for the single-pass sum/sumsq with true-HW denominators).
    hw_pad = 128 if HW < 128 else HW

    # ---------------- fused single-kernel path ----------------
    bytes_per_chan = 4 * hw_pad * itemsize      # (in + out) x double-buffer
    c_blk = _choose_c_block(C, align, bytes_per_chan, budget, N)
    if c_blk is not None:
        xin = jnp.pad(x3, ((0, 0), (0, 0), (0, hw_pad - HW))) if hw_pad != HW else x3
        alias = {"input_output_aliases": {0: 0}} if donate_input else {}
        y3 = pl.pallas_call(
            _make_fused_kernel(HW),
            out_shape=jax.ShapeDtypeStruct((N, C, hw_pad), dtype),
            grid=(N, C // c_blk),
            in_specs=[
                pl.BlockSpec((1, c_blk, hw_pad), lambda n, c: (n, c, 0)),
                pl.BlockSpec((c_blk, 4), lambda n, c: (c, 0)),
            ],
            out_specs=pl.BlockSpec((1, c_blk, hw_pad), lambda n, c: (n, c, 0)),
            compiler_params=pltpu.CompilerParams(
                dimension_semantics=("parallel", "parallel"),
                vmem_limit_bytes=int(vmem_cap)),
            **alias,
        )(xin, params)
        if hw_pad != HW:
            y3 = y3[:, :, :HW]
        return y3.reshape(N, C, H, W)

    # ------------- HW-tiled fallback (huge feature maps) -------------
    # Pass 1 computes per-(N, C) gates with an accumulator over HW blocks;
    # pass 2 applies the gate. Keeps every tile within the VMEM budget.
    hw_pad = _round_up(HW, 128)
    if hw_pad != HW:
        x3 = jnp.pad(x3, ((0, 0), (0, 0), (0, hw_pad - HW)))

    c_cands = sorted({C} | {d for d in range(align, C, align) if C % d == 0},
                     reverse=True)
    c_blk = None
    for d in c_cands:
        if d * 128 * 4 * itemsize <= budget:
            c_blk = d
            break
    if c_blk is None:
        c_blk = c_cands[-1]
    hw_limit = max(128, budget // (4 * c_blk * itemsize))
    hw_blk = _largest_divisor(hw_pad, 128, hw_limit) or 128
    nhw = hw_pad // hw_blk

    g = pl.pallas_call(
        _make_stats_kernel(HW),
        out_shape=jax.ShapeDtypeStruct((N, C, 1), jnp.float32),
        grid=(N, C // c_blk, nhw),
        in_specs=[
            pl.BlockSpec((1, c_blk, hw_blk), lambda n, c, k: (n, c, k)),
            pl.BlockSpec((c_blk, 4), lambda n, c, k: (c, 0)),
        ],
        out_specs=pl.BlockSpec((1, c_blk, 1), lambda n, c, k: (n, c, 0)),
        scratch_shapes=[pltpu.VMEM((c_blk, 1), jnp.float32),
                        pltpu.VMEM((c_blk, 1), jnp.float32)],
        compiler_params=pltpu.CompilerParams(
            dimension_semantics=("parallel", "parallel", "arbitrary"),
            vmem_limit_bytes=int(vmem_cap)),
    )(x3, params)

    alias = {"input_output_aliases": {0: 0}} if donate_input else {}
    y3 = pl.pallas_call(
        _apply_kernel,
        out_shape=jax.ShapeDtypeStruct((N, C, hw_pad), dtype),
        grid=(N, C // c_blk, nhw),
        in_specs=[
            pl.BlockSpec((1, c_blk, hw_blk), lambda n, c, k: (n, c, k)),
            pl.BlockSpec((1, c_blk, 1), lambda n, c, k: (n, c, 0)),
        ],
        out_specs=pl.BlockSpec((1, c_blk, hw_blk), lambda n, c, k: (n, c, k)),
        compiler_params=pltpu.CompilerParams(
            dimension_semantics=("parallel", "parallel", "parallel"),
            vmem_limit_bytes=int(vmem_cap)),
        **alias,
    )(x3, g)
    if hw_pad != HW:
        y3 = y3[:, :, :HW]
    return y3.reshape(N, C, H, W)


# ----------------------------------------------------------------------------
# Pure-JAX reference and self-test
# ----------------------------------------------------------------------------
def _reference(x, cfc, gamma, beta, rmean, rvar, eps=1e-5):
    N, C, H, W = x.shape
    xf = x.reshape(N, C, H * W).astype(jnp.float32)
    mean = xf.mean(axis=2)                                  # (N, C)
    std = jnp.std(xf, axis=2, ddof=1)                       # unbiased, like torch.std
    z = mean * cfc[None, :, 0] + std * cfc[None, :, 1]
    z_hat = (z - rmean[None, :]) / jnp.sqrt(rvar[None, :] + eps) * gamma[None, :] \
        + beta[None, :]
    g = jax.nn.sigmoid(z_hat)
    return x * g[:, :, None, None].astype(x.dtype)


if __name__ == "__main__":
    key = jax.random.PRNGKey(0)
    kx, kc, kx2 = jax.random.split(key, 3)

    N, C, H, W = 2, 4, 16, 16
    x = jax.random.normal(kx, (N, C, H, W), jnp.float32)

    cfc = 0.5 * jax.random.normal(kc, (C, 2), jnp.float32)
    gamma = 1.0 + 0.1 * jnp.arange(C, dtype=jnp.float32)
    beta = 0.05 * jnp.arange(C, dtype=jnp.float32)
    rmean = 0.01 * jnp.arange(C, dtype=jnp.float32)
    rvar = 1.0 + 0.02 * jnp.arange(C, dtype=jnp.float32)

    ref = _reference(x, cfc, gamma, beta, rmean, rvar)

    # 1) Fused single-kernel path.
    y = jax.block_until_ready(srm_layer(x, cfc, gamma, beta, rmean, rvar))
    assert y.shape == x.shape
    assert jnp.allclose(y, ref, atol=1e-5, rtol=1e-5)

    # 2) Default-init sanity: cfc == 0, default BN (eval) -> g == 0.5 -> 0.5 * x.
    y0 = jax.block_until_ready(srm_layer(
        x, jnp.zeros((C, 2), jnp.float32),
        jnp.ones((C,), jnp.float32), jnp.zeros((C,), jnp.float32),
        jnp.zeros((C,), jnp.float32), jnp.ones((C,), jnp.float32)))
    assert jnp.allclose(y0, 0.5 * x, atol=1e-5, rtol=1e-5)

    # 3) Small-spatial (HW < 128) lane-padding path.
    xs = jax.random.normal(kx2, (N, C, 7, 7), jnp.float32)
    ys = jax.block_until_ready(srm_layer(xs, cfc, gamma, beta, rmean, rvar))
    refs = _reference(xs, cfc, gamma, beta, rmean, rvar)
    assert jnp.allclose(ys, refs, atol=1e-5, rtol=1e-5)

    # 4) HW-tiled two-kernel fallback (forced via a tiny per-tile budget).
    yf = jax.block_until_ready(srm_layer(
        x, cfc, gamma, beta, rmean, rvar, max_tile_bytes=8 << 10))
    assert jnp.allclose(yf, ref, atol=1e-5, rtol=1e-5)

    print("KERNEL_OK")
</pallas_src>

<mosaic_0001>
module attributes {stable_mosaic.version = 11 : i64} {
  func.func @kernel(%arg0: i32, %arg1: i32, %arg2: memref<1x4x256xf32, #tpu.memory_space<vmem>>, %arg3: memref<4x4xf32, #tpu.memory_space<vmem>>, %arg4: memref<1x4x256xf32, #tpu.memory_space<vmem>>) attributes {dimension_semantics = [#tpu.dimension_semantics<parallel>, #tpu.dimension_semantics<parallel>], iteration_bounds = array<i64: 2, 1>, scalar_prefetch = 0 : i64, scratch_operands = 0 : i64, tpu.core_type = #tpu.core_type<tc>, window_params = [{transform_indices = @transform_0, window_bounds = array<i64: 1, 4, 256>}, {transform_indices = @transform_1, window_bounds = array<i64: 4, 4>}, {transform_indices = @transform_2, window_bounds = array<i64: 1, 4, 256>}]} {
    %c0 = arith.constant 0 : index
    %c0_0 = arith.constant 0 : index
    %c0_1 = arith.constant 0 : index
    %0 = vector.load %arg2[%c0, %c0_0, %c0_1] : memref<1x4x256xf32, #tpu.memory_space<vmem>>, vector<1x4x256xf32>
    %1 = vector.shape_cast %0 : vector<1x4x256xf32> to vector<4x256xf32>
    %cst = arith.constant dense<0.000000e+00> : vector<4xf32>
    %2 = vector.multi_reduction <add>, %1, %cst [1] : vector<4x256xf32> to vector<4xf32>
    %3 = vector.shape_cast %2 : vector<4xf32> to vector<4x1xf32>
    %4 = arith.mulf %1, %1 : vector<4x256xf32>
    %cst_2 = arith.constant dense<0.000000e+00> : vector<4xf32>
    %5 = vector.multi_reduction <add>, %4, %cst_2 [1] : vector<4x256xf32> to vector<4xf32>
    %6 = vector.shape_cast %5 : vector<4xf32> to vector<4x1xf32>
    %cst_3 = arith.constant 3.906250e-03 : f32
    %7 = vector.broadcast %cst_3 : f32 to vector<4x1xf32>
    %8 = arith.mulf %3, %7 : vector<4x1xf32>
    %9 = arith.mulf %3, %8 : vector<4x1xf32>
    %10 = arith.subf %6, %9 : vector<4x1xf32>
    %cst_4 = arith.constant 0.00392156886 : f32
    %11 = vector.broadcast %cst_4 : f32 to vector<4x1xf32>
    %12 = arith.mulf %10, %11 : vector<4x1xf32>
    %cst_5 = arith.constant 0.000000e+00 : f32
    %13 = vector.broadcast %cst_5 : f32 to vector<4x1xf32>
    %14 = arith.maximumf %12, %13 : vector<4x1xf32>
    %15 = math.sqrt %14 : vector<4x1xf32>
    %c0_6 = arith.constant 0 : index
    %c0_7 = arith.constant 0 : index
    %16 = vector.load %arg3[%c0_6, %c0_7] : memref<4x4xf32, #tpu.memory_space<vmem>>, vector<4x4xf32>
    %17 = vector.extract_strided_slice %16 {offsets = [0, 0], sizes = [4, 1], strides = [1, 1]} : vector<4x4xf32> to vector<4x1xf32>
    %18 = arith.mulf %8, %17 : vector<4x1xf32>
    %19 = vector.extract_strided_slice %16 {offsets = [0, 1], sizes = [4, 1], strides = [1, 1]} : vector<4x4xf32> to vector<4x1xf32>
    %20 = arith.mulf %15, %19 : vector<4x1xf32>
    %21 = arith.addf %18, %20 : vector<4x1xf32>
    %22 = vector.extract_strided_slice %16 {offsets = [0, 2], sizes = [4, 1], strides = [1, 1]} : vector<4x4xf32> to vector<4x1xf32>
    %23 = arith.mulf %21, %22 : vector<4x1xf32>
    %24 = vector.extract_strided_slice %16 {offsets = [0, 3], sizes = [4, 1], strides = [1, 1]} : vector<4x4xf32> to vector<4x1xf32>
    %25 = arith.addf %23, %24 : vector<4x1xf32>
    %cst_8 = arith.constant 0.000000e+00 : f32
    %26 = vector.broadcast %cst_8 : f32 to vector<4x1xf32>
    %27 = arith.subf %26, %25 : vector<4x1xf32>
    %28 = math.exp %27 : vector<4x1xf32>
    %cst_9 = arith.constant 1.000000e+00 : f32
    %29 = vector.broadcast %cst_9 : f32 to vector<4x1xf32>
    %30 = arith.addf %29, %28 : vector<4x1xf32>
    %cst_10 = arith.constant 1.000000e+00 : f32
    %31 = vector.broadcast %cst_10 : f32 to vector<4x1xf32>
    %32 = arith.divf %31, %30 : vector<4x1xf32>
    %33 = vector.broadcast %32 : vector<4x1xf32> to vector<4x256xf32>
    %34 = arith.mulf %1, %33 : vector<4x256xf32>
    %c0_11 = arith.constant 0 : index
    %c0_12 = arith.constant 0 : index
    %c0_13 = arith.constant 0 : index
    %35 = vector.load %arg4[%c0_11, %c0_12, %c0_13] : memref<1x4x256xf32, #tpu.memory_space<vmem>>, vector<1x4x256xf32>
    %36 = vector.shape_cast %35 : vector<1x4x256xf32> to vector<4x256xf32>
    %37 = vector.shape_cast %34 : vector<4x256xf32> to vector<1x4x256xf32>
    tpu.vector_store %arg4[%c0_11, %c0_12, %c0_13], %37 {strides = array<i32>} : memref<1x4x256xf32, #tpu.memory_space<vmem>>, vector<1x4x256xf32>,
    return
  }
  func.func @transform_0(%arg0: i32, %arg1: i32) -> (i32, i32, i32) {
    %c0_i32 = arith.constant 0 : i32
    %c0_i32_0 = arith.constant 0 : i32
    return %arg0, %arg1, %c0_i32 : i32, i32, i32
  }
  func.func @transform_1(%arg0: i32, %arg1: i32) -> (i32, i32) {
    %c0_i32 = arith.constant 0 : i32
    %c0_i32_0 = arith.constant 0 : i32
    return %arg1, %c0_i32 : i32, i32
  }
  func.func @transform_2(%arg0: i32, %arg1: i32) -> (i32, i32, i32) {
    %c0_i32 = arith.constant 0 : i32
    %c0_i32_0 = arith.constant 0 : i32
    return %arg0, %arg1, %c0_i32 : i32, i32, i32
  }
}

</mosaic_0001>

<bundles_post_ra>
// kernel: tpu_custom_call.1
= control target key start
LH: loop header
LB: loop body
LE: loop exit
PB: predicated region body
PF: predicated region fallthrough
CT: control target
= control target key end

     0   :  { %7 = vsyncpa [#allocation3], 0  ;;  %s882_s0 = inlined_call_operand.hbm [shape: f32[2,4,256], index: 0, kind: input, shape index: {}]   ;;  %s883_s1 = inlined_call_operand.hbm [shape: f32[4,4], index: 1, kind: input, shape index: {}]   ;;  %s884_s2 = inlined_call_operand.hbm [shape: f32[2,4,256], index: 2, kind: output, shape index: {}]  }
   0x1   :  { %9 = vsyncpa [#allocation3 + $0x1], 0 }
   0x2   :  { %10 = vsyncpa [#allocation6], 0 }
   0x3   :  { %11 = vsyncpa [#allocation4], 0 }
   0x4   :  { %13 = vsyncpa [#allocation4 + $0x1], 0  ;;  %s654_s9 = smov 0   ;;  %s656_s10 = smov 0  }
   0x5   :  { %s658_s11 = smov 0   ;;  %s660_s12 = smov 0  }
   0x6   :  { %s662_s13 = smov 0   ;;  %s664_s14 = smov 0  }
   0x7 LB: > { %s379_s15 = sadd.s32 4294967295, %s629_s14   ;;  %s380_s16 = sadd.s32 4294967294, %s629_s14   ;;  %s629_s14 = sphi %s664_s14, %s19_s14   ;;  %s625_s13 = sphi %s662_s13, %s909_s13   ;;  %s621_s12 = sphi %s660_s12, %s908_s12   ;;  %s617_s11 = sphi %s658_s11, %s907_s11   ;;  %s613_s10 = sphi %s656_s10, %s906_s10   ;;  %s609_s9 = sphi %s654_s9, %s905_s9  }
   0x8   : > { %p53_p0 = scmp.ne.s32.totalorder %s613_s10, %s609_s9  ;;  %p688_p1 = scmp.eq.s32.totalorder %s379_s15, 0 }
   0x9   : > { %p692_p2 = scmp.eq.s32.totalorder %s379_s15, 1  ;;  %p111_p3 = scmp.eq.s32.totalorder %s380_s16, 1 }
   0xa   : > { %s889_s17 = scalar_select %p688_p1, 1, 0 }
   0xb   : > { %s890_s18 = scalar_select %p692_p2, 1, 0 }
   0xc   : > { %p698_p4 = por %p688_p1, %p53_p0  ;;  %p381_p5 = scmp.ge.s32.totalorder %s629_s14, 1 }
   0xd   : > { %p703_p6 = por %p111_p3, %p53_p0  ;;  %p118_p7 = scmp.lt.s32.totalorder %s629_s14, 3 }
   0xe   : > { %s891_s19 = scalar_select %p698_p4, 1, 0 }
   0xf   : > { %s892_s20 = scalar_select %p703_p6, 1, 0 }
  0x10   : > { %p708_p8 = pnand %p381_p5, %p118_p7  ;;  %s631_s22 = smov [#allocation5]  }
  0x11   : > { %s133_s23 = sshll.u32 %s631_s22, 4  ;;  %s31_s25 = sadd.s32 1, %s625_s13  ;;  %s134_s23 = int_to_ptr.vmem [resolvable:$true] %s133_s23 }
  0x12   : > { %s893_s21 = scalar_select %p708_p8, 1, 0 }
  0x13   : > { %p406_p10 = pneg %p708_p8  ;;  %s40_s26 = sadd.s32 1, %s617_s11 }
  0x14   : > { %p723_p12 = scmp.ge.s32.totalorder %s31_s25, 2  ;;  %s485_s30 = scalar_lea.hbm %s883_s1, 64 }
  0x15   : > { %p717_p11 = pnand %p406_p10, %p688_p1  ;;  %p486_p13 = scmp.ne.s32.totalorder %s883_s1, %s485_s30 }
  0x16   : > { %s895_s27 = scalar_select %p723_p12, 1, 0 }
  0x17   : > { %p487_p0 = pneg %p717_p11  ;;  %p492_p7 = scmp.lt.u32.totalorder %s485_s30, %s883_s1 }
  0x19   : > { %p488_p3 = pnand %p487_p0, %p486_p13 }
  0x1b   : > { %p489_p5 = pneg %p488_p3 }
  0x1d   : > { %p494_p10 = pnand %p492_p7, %p489_p5 }
  0x1f   : > { %497 = shalt.err (!%p494_p10)
}
  0x20   : > { %s498_s7 = scalar_lea.vmem %s134_s23, 64  ;;  %p506_p4 = scmp.lt.s32.totalorder %s134_s23, %s134_s23 }
  0x21   : > { %p499_p9 = scmp.ne.s32.totalorder %s134_s23, %s498_s7  ;;  %p507_p8 = scmp.lt.s32.totalorder %s498_s7, %s498_s7 }
  0x23   : > { %p501_p6 = pnand %p499_p9, %p487_p0  ;;  %p508_p2 = por %p507_p8, %p506_p4 }
  0x25   : > { %p502_p1 = pneg %p501_p6 }
  0x27   : > { %p509_p12 = pnand %p508_p2, %p502_p1 }
  0x29   : > { %512 = shalt.err (!%p509_p12)
}
  0x2a   : > { %409 = dma.hbm_to_vmem [thread:$0]  (!%p717_p11), %s883_s1, 64, %s134_s23, [#allocation6]  }
  0x2b   : > { %p896_p4 = scmp.ne.s32.totalorder %s895_s27, 0  ;;  %p47_p1 = scmp.ne.s32.totalorder %s617_s11, %s613_s10 }
  0x2c   : > { %p48_p2 = scmp.eq.s32.totalorder %s629_s14, 0  ;;  %p419_p6 = scmp.lt.s32.totalorder %s629_s14, 2 }
  0x2d   : > { %s911_s25 = smov (%p896_p4, %s31_s25), 0  ;;  %p897_p12 = scmp.ne.s32.totalorder %s890_s18, 0 }
  0x2e   : > { %s35_s16 = ssub.s32 %s625_s13, %s911_s25  ;;  %p49_p9 = por %p48_p2, %p47_p1 }
  0x2f   : > { %p38_p8 = scmp.eq.s32.totalorder %s35_s16, 0  ;;  %p755_p13 = por %p897_p12, %p47_p1 }
  0x30   : > { %s144_s24 = sand.u32 1, %s617_s11   ;;  %s396_s27 = sshll.u32 %s625_s13, 7 }
  0x31   : > { %s763_s28 = scalar_select %p38_p8, %s617_s11, %s40_s26  }
  0x32   : > { %s384_s23 = sshll.u32 %s144_s24, 3  ;;  %s769_s3 = scalar_lea.hbm %s882_s0, %s396_s27 }
  0x33   : > { %s148_s18 = scalar_lea.vmem [#allocation2], %s384_s23  ;;  %p773_p11 = pnand %p419_p6, %p49_p9 }
  0x34   : > { %s158_s4 = sshll.u32 %s148_s18, 4  ;;  %s145_s26 = scalar_lea.sflag [#allocation3], %s144_s24  ;;  %s771_s4 = int_to_ptr.vmem [resolvable:$true] %s158_s4 }
  0x35   : > { %s513_s6 = scalar_lea.hbm %s769_s3, 128  ;;  %p515_p3 = pneg %p773_p11 }
  0x36   : > { %p514_p0 = scmp.ne.s32.totalorder %s769_s3, %s513_s6  ;;  %s518_s15 = scalar_lea.hbm %s882_s0, 256 }
  0x37   : > { %p519_p10 = scmp.lt.u32.totalorder %s769_s3, %s882_s0  ;;  %p520_p4 = scmp.lt.u32.totalorder %s518_s15, %s513_s6 }
  0x38   : > { %p516_p5 = pnand %p515_p3, %p514_p0  ;;  %p522_p2 = scmp.lt.u32.totalorder %s513_s6, %s769_s3 }
  0x39   : > { %p521_p1 = por %p520_p4, %p519_p10 }
  0x3a   : > { %p517_p7 = pneg %p516_p5 }
  0x3b   : > { %p523_p6 = por %p522_p2, %p521_p1 }
  0x3d   : > { %p524_p8 = pnand %p523_p6, %p517_p7 }
  0x3f   : > { %527 = shalt.err (!%p524_p8)
}
  0x40   : > { %s528_s24 = scalar_lea.vmem %s771_s4, 128  ;;  %s632_s27 = smov [#allocation2]  }
  0x41   : > { %p529_p9 = scmp.ne.s32.totalorder %s771_s4, %s528_s24  ;;  %s533_s29 = sshll.u32 %s632_s27, 4  ;;  %s534_s29 = int_to_ptr.vmem [resolvable:$false] %s533_s29 }
  0x42   : > { %s535_s30 = scalar_lea.vmem %s534_s29, 256  ;;  %p536_p5 = scmp.lt.s32.totalorder %s771_s4, %s534_s29 }
  0x43   : > { %p531_p12 = pnand %p529_p9, %p515_p3  ;;  %p537_p10 = scmp.lt.s32.totalorder %s535_s30, %s528_s24 }
  0x45   : > { %p532_p0 = pneg %p531_p12  ;;  %p538_p4 = por %p537_p10, %p536_p5 }
  0x47   : > { %p539_p1 = pnand %p538_p4, %p532_p0 }
  0x49   : > { %542 = shalt.err (!%p539_p1)
}
  0x4a   : > { %413 = dma.hbm_to_vmem [thread:$0]  (!%p773_p11), %s769_s3, 128, %s771_s4, %s145_s26  }
  0x4b   : > { %p900_p7 = scmp.ne.s32.totalorder %s893_s21, 0 }
  0x4c   : > { %s805_s18 = sand.u32 (!%p900_p7), 1, %s613_s10   ;;  %p901_p3 = scmp.ne.s32.totalorder (!%p900_p7), %s891_s19, 0 }
  0x4d   : > { %167 = sbr.rel (%p900_p7) target bundleno = 560 (0x230), region = 28  ;;  %s388_s6 = sshll.u32 (!%p900_p7), %s805_s18, 3 }
  0x4e   : > { %s170_s7 = scalar_lea.sflag (!%p900_p7), [#allocation3], %s805_s18  ;;  %s173_s8 = scalar_lea.vmem (!%p900_p7), [#allocation2], %s388_s6 }
  0x54   : > { %596 = dma.done.wait (%p901_p3), %s170_s7, 128  }
  0x55   : > { %598 = vsyncadd (%p901_p3), %s170_s7, 4294967168  ;;  %p902_p11 = scmp.ne.s32.totalorder %s889_s17, 0 }
  0x57   : > { %600 = dma.done.wait (%p902_p11), [#allocation6], 64  }
  0x58   : > { %602 = vsyncadd (%p902_p11), [#allocation6], 4294967232  ;;  %vm202_vm0 = vcmask 1043456   ;;  %v819_v0 = vld [vmem:[%s173_s8] sm:$0xff]  ;;  %v229_v10 = vld [vmem:[#allocation5] sm:$0xf]  ;;  %v259_v39 = vlaneseq }
  0x59   : > { %v200_v1 = vcombine.high %v819_v0, %v819_v0  ;;  %v203_v2 = vsel %vm202_vm0, %v819_v0, 0.0  ;;  %v208_v3 = vmul.f32 %v819_v0, %v819_v0  ;;  %s633_s17 = smov 125   ;;  %s634_s19 = smov 127   ;;  %v636_v24 = vmov 0  }
  0x5a   : > { %s635_s21 = smov 126   ;;  %476 = vset.pattern.permute.xlu1 %v636_v24  ;;  %477 = vset.pattern.permute.xlu0 %v636_v24  ;;  %v637_v37 = vmov 839922192   ;;  %v260_v41 = vshrl.u32 %v259_v39, 7  ;;  %s397_s3 = sshll.u32 %s621_s12, 7 }
  0x5b   : > { %v204_v4 = vsel %vm202_vm0, %v200_v1, 0.0  ;;  %v210_v5 = vcombine.high %v208_v3, %v208_v3  ;;  %v212_v6 = vsel %vm202_vm0, %v208_v3, 0.0  ;;  %v257_v38 = vunpack.c.l.s4 %v637_v37  ;;  %s197_s4 = scalar_lea.vmem [#allocation7], %s388_s6  ;;  %s833_s16 = scalar_lea.hbm %s884_s2, %s397_s3 }
  0x5c   : > { %v205_v7 = vadd.f32 %v204_v4, %v203_v2  ;;  %s283_s5 = sshll.u32 %s197_s4, 4  ;;  %s267_s23 = scalar_lea.sflag [#allocation4], %s805_s18  ;;  %s835_s5 = int_to_ptr.vmem [resolvable:$true] %s283_s5 }
  0x5d   : > { %v213_v8 = vsel %vm202_vm0, %v210_v5, 0.0  ;;  %v258_v40 = vunpack.c.0.s8 %v257_v38  ;;  %s543_s24 = scalar_lea.vmem %s835_s5, 128  ;;  %s638_s12 = smov [#allocation7]  }
  0x5e   : > { %206 = vadd.xlane.f32.xlu0 %v205_v7  ;;  %v214_v9 = vadd.f32 %v213_v8, %v212_v6  ;;  %p544_p2 = scmp.ne.s32.totalorder %s835_s5, %s543_s24  ;;  %s547_s27 = sshll.u32 %s638_s12, 4  ;;  %s548_s27 = int_to_ptr.vmem [resolvable:$false] %s547_s27 }
  0x5f   : > { %v261_v42 = vsub.s32 %v258_v40, %v260_v41  ;;  %s549_s29 = scalar_lea.vmem %s548_s27, 256  ;;  %p550_p9 = scmp.lt.s32.totalorder %s835_s5, %s548_s27 }
  0x60   : > { %p545_p6 = pnand %p544_p2, %p755_p13  ;;  %p551_p12 = scmp.lt.s32.totalorder %s549_s29, %s543_s24 }
  0x62   : > { %215 = vadd.xlane.f32.xlu0 %v214_v9  ;;  %p546_p8 = pneg %p545_p6  ;;  %p552_p0 = por %p551_p12, %p550_p9 }
  0x64   : > { %p553_p5 = pnand %p552_p0, %p546_p8 }
  0x78   : > { %242 = vrot.lane.b32.xlu0 %v229_v10, %s633_s17 }
  0xeb   : > { %v207_v11 = vpop.xlane.xlu0 %206 }
  0xec   : > { %v217_v12 = vmul.f32 0.00390625, %v207_v11 }
  0xee   : > { %v218_v13 = vmul.f32 %v217_v12, %v207_v11  ;;  %v230_v26 = vmul.f32 %v229_v10, %v217_v12 }
  0xef   : > { %v216_v14 = vpop.xlane.xlu0 %215 }
  0xf0   : > { %v219_v15 = vsub.f32 %v216_v14, %v218_v13 }
  0xf2   : > { %v220_v16 = vmul.f32 0.003921569, %v219_v15 }
  0xf3   : > { %v243_v29 = vpop.permute.xlu0 %242 }
  0xf4   : > { %v221_v17 = vmax.f32 %v220_v16, 0.0 }
  0xf6   : > { %479 = vrsqrt.f32 %v221_v17  ;;  %vm224_vm1 = vcmp.eq.f32.partialorder %v221_v17, inf  ;;  %v227_v20 = vand.u32 2147483648, %v221_v17  ;;  %vm226_vm2 = vcmp.eq.f32.partialorder %v221_v17, 0.0 }
 0x100   : > { %v480_v18 = vpop.eup %479 }
 0x101   : > { %v223_v19 = vmul.f32 %v480_v18, %v221_v17 }
 0x103   : > { %v225_v21 = vsel %vm224_vm1, %v221_v17, %v223_v19 }
 0x104   : > { %v228_v22 = vsel %vm226_vm2, %v227_v20, %v225_v21 }
 0x105   : > { %v231_v23 = vmul.f32 %v229_v10, %v228_v22 }
 0x107   : > { %233 = vrot.lane.b32.xlu1 %v231_v23, %s634_s19 }
 0x10b   : > { %238 = vrot.lane.b32.xlu1 %v229_v10, %s635_s21 }
 0x179   : > { %v234_v25 = vpop.permute.xlu1 %233 }
 0x17a   : > { %v236_v27 = vadd.f32 %v234_v25, %v230_v26 }
 0x17d   : > { %v239_v28 = vpop.permute.xlu1 %238 }
 0x17e   : > { %v241_v30 = vmul.f32 %v239_v28, %v236_v27 }
 0x180   : > { %v245_v31 = vadd.f32 %v243_v29, %v241_v30 }
 0x182   : > { %v246_v32 = vsub.f32 0.0, %v245_v31 }
 0x184   : > { %v247_v33 = vmul.f32 1.442695, %v246_v32 }
 0x186   : > { %481 = vpow2.f32 %v247_v33 }
 0x190   : > { %v482_v34 = vpop.eup %481 }
 0x191   : > { %v249_v35 = vadd.f32 1.0, %v482_v34 }
 0x193   : > { %483 = vrcp.f32 %v249_v35 }
 0x19d   : > { %v484_v36 = vpop.eup %483 }
 0x19e   : > { %254 = vperm.xlu1 %476, %v484_v36  }
 0x21d   : > { %v255_v43 = vpop.permute.xlu1 %254 }
 0x21e   : > { %v262_v44 = vrot.slane %v255_v43, %v261_v42 }
 0x220   : > { %v264_v45 = vmul.f32 %v262_v44, %v819_v0 }
 0x222   : > { %265 = vst [vmem:[%s197_s4] sm:$0xff] %v264_v45 }
 0x223   : > { %556 = shalt.err (!%p553_p5)
}
 0x224   : > { %s557_s30 = scalar_lea.hbm %s833_s16, 128  ;;  %s561_s7 = scalar_lea.hbm %s884_s2, 256 }
 0x225   : > { %p558_p10 = scmp.ne.s32.totalorder %s833_s16, %s557_s30  ;;  %p562_p7 = scmp.lt.u32.totalorder %s833_s16, %s884_s2 }
 0x226   : > { %p563_p3 = scmp.lt.u32.totalorder %s561_s7, %s557_s30  ;;  %p565_p2 = scmp.lt.u32.totalorder %s557_s30, %s833_s16 }
 0x227   : > { %p559_p4 = pnand %p558_p10, %p755_p13 }
 0x228   : > { %p564_p11 = por %p563_p3, %p562_p7 }
 0x229   : > { %p560_p1 = pneg %p559_p4 }
 0x22a   : > { %p566_p6 = por %p565_p2, %p564_p11 }
 0x22c   : > { %p567_p8 = pnand %p566_p6, %p560_p1 }
 0x22e   : > { %570 = shalt.err (!%p567_p8)
}
 0x22f   : > { %404 = dma.vmem_to_hbm [thread:$0]  (%p755_p13), %s835_s5, 128, %s833_s16, %s267_s23  }
 0x230 PF: > { %s295_s19 = sand.u32 1, %s609_s9   ;;  %p903_p9 = scmp.ne.s32.totalorder %s892_s20, 0 }
 0x231   : > { %p904_p12 = scmp.ge.s32.totalorder %s629_s14, 2  ;;  %s296_s21 = scalar_lea.sflag [#allocation4], %s295_s19 }
 0x233   : > { %p415_p0 = pnand %p904_p12, %p903_p9 }
 0x235   : > { %604 = dma.done.wait (!%p415_p0), %s296_s21, 128  }
 0x236   : > { %606 = vsyncadd (!%p415_p0), %s296_s21, 4294967168  ;;  %s19_s14 = sadd.s32 1, %s629_s14   ;;  %s905_s9 = smov %s613_s10 }
 0x237   : > { %p16_p5 = scmp.ge.s32.totalorder %s19_s14, 4   ;;  %s906_s10 = smov %s617_s11 }
 0x238   : > { %s907_s11 = smov %s763_s28  ;;  %s908_s12 = smov %s625_s13 }
 0x239   : > { %s909_s13 = smov %s911_s25  ;;  %18 = sbr.rel (!%p16_p5) target bundleno = 7 (0x7), region = 78 }
 0x240   :  { %301 = vsyncpa [#allocation3], 1 }
 0x241   :  { %303 = vsyncpa [#allocation3 + $0x1], 1 }
 0x242   :  { %304 = vsyncpa [#allocation6], 1 }
 0x243   :  { %305 = vsyncpa [#allocation4], 1 }
 0x244   :  { %307 = vsyncpa [#allocation4 + $0x1], 1 }

</bundles_post_ra>
